<compile_context>
chip_gen: v5e
topology: v5e:2x2
jax: 0.10.0
libtpu: 0.0.40
codegen_flags: <defaults>
</compile_context>

<pallas_src>
import functools

import jax
import jax.numpy as jnp
from jax.experimental import pallas as pl
from jax.experimental.pallas import tpu as pltpu


_LANE = 128      # lane width (last dim)
_SUBLANE = 8     # f32 sublane width (second-to-last dim)


def _round_up(x, m):
    return ((x + m - 1) // m) * m


def _pad2d(a, rows, cols):
    """Embed 2-D array `a` into a zero-initialized [rows, cols] array."""
    return jnp.zeros((rows, cols), a.dtype).at[: a.shape[0], : a.shape[1]].set(a)


def _mlp_fused_kernel(*refs, num_hidden, leaky_slope):
    """Entire MLP in one kernel invocation.

    refs layout: x_ref, (w_ref, b_ref) * num_hidden, w_out_ref, b_out_ref, o_ref
      x_ref  : [Bp, Din_p]        (Bp multiple of 8, Din_p multiple of 128)
      w_ref  : [prev_p, cur_p]    (lane-dense, zero-padded rows/cols)
      b_ref  : [1, cur_p]
      o_ref  : [Bp, Out_p]
    Activations stay in vregs between layers; weights are VMEM-resident.
    """
    x_ref = refs[0]
    o_ref = refs[-1]

    h = x_ref[...]
    idx = 1
    for _ in range(num_hidden):
        w = refs[idx][...]
        b = refs[idx + 1][...]
        idx += 2
        h = jnp.dot(h, w, preferred_element_type=jnp.float32) + b
        # LeakyReLU(slope) for slope < 1: max(y, slope*y)  (one vmul + one vmax).
        h = jnp.maximum(h, leaky_slope * h)

    w_out = refs[idx][...]
    b_out = refs[idx + 1][...]
    y = jnp.dot(h, w_out, preferred_element_type=jnp.float32) + b_out
    o_ref[...] = y.astype(o_ref.dtype)


def init_mlp_params(key, input_dim, output_dim, total_hidden_layers, neurons_per_layer):
    """Deterministic parameter init mirroring the nn.Linear shapes of the module."""
    params = []
    last_dim = input_dim
    dims = [int(neurons_per_layer)] * int(total_hidden_layers) + [int(output_dim)]
    for d in dims:
        key, kw, kb = jax.random.split(key, 3)
        bound = 1.0 / jnp.sqrt(jnp.float32(last_dim))
        # stored as [in_dim, out_dim] (transpose of PyTorch's [out, in])
        w = jax.random.uniform(kw, (last_dim, d), jnp.float32, -bound, bound)
        b = jax.random.uniform(kb, (1, d), jnp.float32, -bound, bound)
        params.append((w, b))
        last_dim = d
    return params


def mlp_forward(x, params, dropout_rate=0.0, leaky_slope=0.02):
    """Forward pass matching MLP.forward (inference semantics), one fused Pallas call."""
    B = x.shape[0]
    h = x.reshape(B, -1).astype(jnp.float32)   # x.view(x.shape[0], -1)
    din = h.shape[1]
    out_dim = params[-1][0].shape[1]

    # --- pad everything to TPU-friendly (sublane, lane) shapes -------------
    bp = _round_up(B, _SUBLANE)
    din_p = _round_up(din, _LANE)
    x_pad = _pad2d(h, bp, din_p)

    flat = []
    last_p = din_p
    for (w, b) in params:
        dout_p = _round_up(w.shape[1], _LANE)
        flat.append(_pad2d(w, last_p, dout_p))            # zero-padded rows/cols
        flat.append(_pad2d(b.reshape(1, -1), 1, dout_p))  # zero-padded bias
        last_p = dout_p
    out_p = last_p

    num_hidden = len(params) - 1
    kernel = functools.partial(
        _mlp_fused_kernel, num_hidden=num_hidden, leaky_slope=leaky_slope
    )

    n_inputs = 1 + len(flat)
    out_pad = pl.pallas_call(
        kernel,
        out_shape=jax.ShapeDtypeStruct((bp, out_p), jnp.float32),
        in_specs=[pl.BlockSpec(memory_space=pltpu.MemorySpace.VMEM)] * n_inputs,
        out_specs=pl.BlockSpec(memory_space=pltpu.MemorySpace.VMEM),
    )(x_pad, *flat)

    # slice back to the logical shape (padded rows/cols are discarded)
    return out_pad[:B, :out_dim]


if __name__ == "__main__":
    # Small shapes consistent with the module: an NCHW image batch that gets flattened.
    B, C, H, W = 2, 4, 16, 16          # input_dim = C*H*W = 1024
    input_dim = C * H * W
    output_dim = 10
    total_hidden_layers = 2
    neurons_per_layer = 32
    dropout_rate = 0.1                  # identity at inference

    key = jax.random.PRNGKey(0)
    key, kx = jax.random.split(key)
    x = jax.random.normal(kx, (B, C, H, W), jnp.float32)

    params = init_mlp_params(key, input_dim, output_dim,
                             total_hidden_layers, neurons_per_layer)

    fwd = jax.jit(mlp_forward)
    out = fwd(x, params)
    jax.block_until_ready(out)
    assert out.shape == (B, output_dim)

    # Pure-JAX reference of the same math (unpadded).
    ref = x.reshape(B, -1).astype(jnp.float32)
    for (w, b) in params[:-1]:
        ref = ref @ w + b
        ref = jnp.where(ref >= 0, ref, 0.02 * ref)
    ref = ref @ params[-1][0] + params[-1][1]
    assert jnp.allclose(out, ref, atol=1e-4, rtol=1e-4), "mismatch vs reference"

    print("KERNEL_OK")
</pallas_src>

<mosaic_0001>
module attributes {stable_mosaic.version = 11 : i64} {
  func.func @_mlp_fused_kernel(%arg0: memref<8x1024xf32, #tpu.memory_space<vmem>>, %arg1: memref<1024x128xf32, #tpu.memory_space<vmem>>, %arg2: memref<1x128xf32, #tpu.memory_space<vmem>>, %arg3: memref<128x128xf32, #tpu.memory_space<vmem>>, %arg4: memref<1x128xf32, #tpu.memory_space<vmem>>, %arg5: memref<128x128xf32, #tpu.memory_space<vmem>>, %arg6: memref<1x128xf32, #tpu.memory_space<vmem>>, %arg7: memref<8x128xf32, #tpu.memory_space<vmem>>) attributes {dimension_semantics = [], scalar_prefetch = 0 : i64, scratch_operands = 0 : i64, tpu.core_type = #tpu.core_type<tc>} {
    %c0 = arith.constant 0 : index
    %c0_0 = arith.constant 0 : index
    %0 = vector.load %arg0[%c0, %c0_0] : memref<8x1024xf32, #tpu.memory_space<vmem>>, vector<8x1024xf32>
    %c0_1 = arith.constant 0 : index
    %c0_2 = arith.constant 0 : index
    %1 = vector.load %arg1[%c0_1, %c0_2] : memref<1024x128xf32, #tpu.memory_space<vmem>>, vector<1024x128xf32>
    %c0_3 = arith.constant 0 : index
    %c0_4 = arith.constant 0 : index
    %2 = vector.load %arg2[%c0_3, %c0_4] : memref<1x128xf32, #tpu.memory_space<vmem>>, vector<1x128xf32>
    %cst = arith.constant dense<0.000000e+00> : vector<8x128xf32>
    %3 = tpu.matmul %0, %1, %cst {dimension_numbers = #tpu.dot_dimension_numbers<[1], [0], [0], [1], [0, 0, 1, 1], [], []>} : vector<8x1024xf32>, vector<1024x128xf32>, vector<8x128xf32> -> vector<8x128xf32>
    %4 = vector.broadcast %2 : vector<1x128xf32> to vector<8x128xf32>
    %5 = arith.addf %3, %4 : vector<8x128xf32>
    %cst_5 = arith.constant 2.000000e-02 : f32
    %6 = vector.broadcast %cst_5 : f32 to vector<8x128xf32>
    %7 = arith.mulf %6, %5 : vector<8x128xf32>
    %8 = arith.maximumf %5, %7 : vector<8x128xf32>
    %c0_6 = arith.constant 0 : index
    %c0_7 = arith.constant 0 : index
    %9 = vector.load %arg3[%c0_6, %c0_7] : memref<128x128xf32, #tpu.memory_space<vmem>>, vector<128x128xf32>
    %c0_8 = arith.constant 0 : index
    %c0_9 = arith.constant 0 : index
    %10 = vector.load %arg4[%c0_8, %c0_9] : memref<1x128xf32, #tpu.memory_space<vmem>>, vector<1x128xf32>
    %cst_10 = arith.constant dense<0.000000e+00> : vector<8x128xf32>
    %11 = tpu.matmul %8, %9, %cst_10 {dimension_numbers = #tpu.dot_dimension_numbers<[1], [0], [0], [1], [0, 0, 1, 1], [], []>} : vector<8x128xf32>, vector<128x128xf32>, vector<8x128xf32> -> vector<8x128xf32>
    %12 = vector.broadcast %10 : vector<1x128xf32> to vector<8x128xf32>
    %13 = arith.addf %11, %12 : vector<8x128xf32>
    %cst_11 = arith.constant 2.000000e-02 : f32
    %14 = vector.broadcast %cst_11 : f32 to vector<8x128xf32>
    %15 = arith.mulf %14, %13 : vector<8x128xf32>
    %16 = arith.maximumf %13, %15 : vector<8x128xf32>
    %c0_12 = arith.constant 0 : index
    %c0_13 = arith.constant 0 : index
    %17 = vector.load %arg5[%c0_12, %c0_13] : memref<128x128xf32, #tpu.memory_space<vmem>>, vector<128x128xf32>
    %c0_14 = arith.constant 0 : index
    %c0_15 = arith.constant 0 : index
    %18 = vector.load %arg6[%c0_14, %c0_15] : memref<1x128xf32, #tpu.memory_space<vmem>>, vector<1x128xf32>
    %cst_16 = arith.constant dense<0.000000e+00> : vector<8x128xf32>
    %19 = tpu.matmul %16, %17, %cst_16 {dimension_numbers = #tpu.dot_dimension_numbers<[1], [0], [0], [1], [0, 0, 1, 1], [], []>} : vector<8x128xf32>, vector<128x128xf32>, vector<8x128xf32> -> vector<8x128xf32>
    %20 = vector.broadcast %18 : vector<1x128xf32> to vector<8x128xf32>
    %21 = arith.addf %19, %20 : vector<8x128xf32>
    %c0_17 = arith.constant 0 : index
    %c0_18 = arith.constant 0 : index
    %22 = vector.load %arg7[%c0_17, %c0_18] : memref<8x128xf32, #tpu.memory_space<vmem>>, vector<8x128xf32>
    tpu.vector_store %arg7[%c0_17, %c0_18], %21 {strides = array<i32>} : memref<8x128xf32, #tpu.memory_space<vmem>>, vector<8x128xf32>,
    return
  }
}

</mosaic_0001>

<bundles_post_ra>
// kernel: mlp_forward.1
= control target key start
LH: loop header
LB: loop body
LE: loop exit
PB: predicated region body
PF: predicated region fallthrough
CT: control target
= control target key end

     0   :  { %s974_s1 = inlined_call_operand.vmem [shape: f32[1024,128], index: 1, kind: input, shape index: {}]   ;;  %s975_s2 = inlined_call_operand.vmem [shape: f32[1,128], index: 2, kind: input, shape index: {}]   ;;  %s976_s0 = inlined_call_operand.vmem [shape: f32[8,1024], index: 0, kind: input, shape index: {}]   ;;  %s977_s3 = inlined_call_operand.vmem [shape: f32[128,128], index: 3, kind: input, shape index: {}]   ;;  %s978_s4 = inlined_call_operand.vmem [shape: f32[1,128], index: 4, kind: input, shape index: {}]   ;;  %s979_s5 = inlined_call_operand.vmem [shape: f32[128,128], index: 5, kind: input, shape index: {}]   ;;  %s980_s6 = inlined_call_operand.vmem [shape: f32[1,128], index: 6, kind: input, shape index: {}]   ;;  %s981_s7 = inlined_call_operand.vmem [shape: f32[8,128], index: 7, kind: output, shape index: {}]  }
   0x1   :  { %v81_v0 = vld [vmem:[%s974_s1 + $0x178] sm:$0xff]  ;;  %v80_v2 = vld [vmem:[%s974_s1 + $0x170] sm:$0xff]  ;;  %v79_v6 = vld [vmem:[%s974_s1 + $0x168] sm:$0xff] }
   0x2   :  { %v49_v1 = vld [vmem:[%s974_s1 + $0x78] sm:$0xff]  ;;  %206 = vmatpush.msra.mxu2 %v81_v0  ;;  %v48_v4 = vld [vmem:[%s974_s1 + $0x70] sm:$0xff]  ;;  %v47_v8 = vld [vmem:[%s974_s1 + $0x68] sm:$0xff] }
   0x3   :  { %166 = vmatpush.msra.mxu0 %v49_v1  ;;  %v97_v3 = vld [vmem:[%s974_s1 + $0x1f8] sm:$0xff]  ;;  %v96_v7 = vld [vmem:[%s974_s1 + $0x1f0] sm:$0xff]  ;;  %v95_v10 = vld [vmem:[%s974_s1 + $0x1e8] sm:$0xff] }
   0x4   :  { %v65_v5 = vld [vmem:[%s974_s1 + $0xf8] sm:$0xff]  ;;  %226 = vmatpush.msra.mxu3 %v97_v3  ;;  %207 = vmatpush.msra.mxu2 %v80_v2  ;;  %v64_v9 = vld [vmem:[%s974_s1 + $0xf0] sm:$0xff]  ;;  %v78_v11 = vld [vmem:[%s974_s1 + $0x160] sm:$0xff] }
   0x5   :  { %186 = vmatpush.msra.mxu1 %v65_v5  ;;  %167 = vmatpush.msra.mxu0 %v48_v4  ;;  %v46_v12 = vld [vmem:[%s974_s1 + $0x60] sm:$0xff]  ;;  %v63_v13 = vld [vmem:[%s974_s1 + $0xe8] sm:$0xff]  ;;  %v77_v16 = vld [vmem:[%s974_s1 + $0x158] sm:$0xff] }
   0x6   :  { %227 = vmatpush.msra.mxu3 %v96_v7  ;;  %208 = vmatpush.msra.mxu2 %v79_v6  ;;  %v94_v14 = vld [vmem:[%s974_s1 + $0x1e0] sm:$0xff]  ;;  %v45_v17 = vld [vmem:[%s974_s1 + $0x58] sm:$0xff]  ;;  %v76_v20 = vld [vmem:[%s974_s1 + $0x150] sm:$0xff] }
   0x7   :  { %187 = vmatpush.msra.mxu1 %v64_v9  ;;  %168 = vmatpush.msra.mxu0 %v47_v8  ;;  %v62_v15 = vld [vmem:[%s974_s1 + $0xe0] sm:$0xff]  ;;  %v93_v18 = vld [vmem:[%s974_s1 + $0x1d8] sm:$0xff]  ;;  %v44_v21 = vld [vmem:[%s974_s1 + $0x50] sm:$0xff] }
   0x8   :  { %228 = vmatpush.msra.mxu3 %v95_v10  ;;  %209 = vmatpush.msra.mxu2 %v78_v11  ;;  %v61_v19 = vld [vmem:[%s974_s1 + $0xd8] sm:$0xff]  ;;  %v92_v22 = vld [vmem:[%s974_s1 + $0x1d0] sm:$0xff]  ;;  %v75_v24 = vld [vmem:[%s974_s1 + $0x148] sm:$0xff] }
   0x9   :  { %188 = vmatpush.msra.mxu1 %v63_v13  ;;  %169 = vmatpush.msra.mxu0 %v46_v12  ;;  %v60_v23 = vld [vmem:[%s974_s1 + $0xd0] sm:$0xff]  ;;  %v43_v25 = vld [vmem:[%s974_s1 + $0x48] sm:$0xff]  ;;  %v74_v28 = vld [vmem:[%s974_s1 + $0x140] sm:$0xff] }
   0xa   :  { %229 = vmatpush.msra.mxu3 %v94_v14  ;;  %210 = vmatpush.msra.mxu2 %v77_v16  ;;  %v91_v26 = vld [vmem:[%s974_s1 + $0x1c8] sm:$0xff]  ;;  %v42_v29 = vld [vmem:[%s974_s1 + $0x40] sm:$0xff]  ;;  %v73_v32 = vld [vmem:[%s974_s1 + $0x138] sm:$0xff] }
   0xb   :  { %189 = vmatpush.msra.mxu1 %v62_v15  ;;  %170 = vmatpush.msra.mxu0 %v45_v17  ;;  %v59_v27 = vld [vmem:[%s974_s1 + $0xc8] sm:$0xff]  ;;  %v90_v30 = vld [vmem:[%s974_s1 + $0x1c0] sm:$0xff]  ;;  %v41_v33 = vld [vmem:[%s974_s1 + $0x38] sm:$0xff] }
   0xc   :  { %230 = vmatpush.msra.mxu3 %v93_v18  ;;  %211 = vmatpush.msra.mxu2 %v76_v20  ;;  %v58_v31 = vld [vmem:[%s974_s1 + $0xc0] sm:$0xff]  ;;  %v89_v34 = vld [vmem:[%s974_s1 + $0x1b8] sm:$0xff]  ;;  %v72_v36 = vld [vmem:[%s974_s1 + $0x130] sm:$0xff] }
   0xd   :  { %190 = vmatpush.msra.mxu1 %v61_v19  ;;  %171 = vmatpush.msra.mxu0 %v44_v21  ;;  %v57_v35 = vld [vmem:[%s974_s1 + $0xb8] sm:$0xff]  ;;  %v40_v37 = vld [vmem:[%s974_s1 + $0x30] sm:$0xff]  ;;  %v71_v40 = vld [vmem:[%s974_s1 + $0x128] sm:$0xff] }
   0xe   :  { %231 = vmatpush.msra.mxu3 %v92_v22  ;;  %212 = vmatpush.msra.mxu2 %v75_v24  ;;  %v88_v38 = vld [vmem:[%s974_s1 + $0x1b0] sm:$0xff]  ;;  %v39_v41 = vld [vmem:[%s974_s1 + $0x28] sm:$0xff]  ;;  %v70_v44 = vld [vmem:[%s974_s1 + $0x120] sm:$0xff] }
   0xf   :  { %191 = vmatpush.msra.mxu1 %v60_v23  ;;  %172 = vmatpush.msra.mxu0 %v43_v25  ;;  %v56_v39 = vld [vmem:[%s974_s1 + $0xb0] sm:$0xff]  ;;  %v87_v42 = vld [vmem:[%s974_s1 + $0x1a8] sm:$0xff]  ;;  %v38_v45 = vld [vmem:[%s974_s1 + $0x20] sm:$0xff] }
  0x10   :  { %232 = vmatpush.msra.mxu3 %v91_v26  ;;  %213 = vmatpush.msra.mxu2 %v74_v28  ;;  %v55_v43 = vld [vmem:[%s974_s1 + $0xa8] sm:$0xff]  ;;  %v86_v46 = vld [vmem:[%s974_s1 + $0x1a0] sm:$0xff]  ;;  %v69_v48 = vld [vmem:[%s974_s1 + $0x118] sm:$0xff] }
  0x11   :  { %192 = vmatpush.msra.mxu1 %v59_v27  ;;  %173 = vmatpush.msra.mxu0 %v42_v29  ;;  %v54_v47 = vld [vmem:[%s974_s1 + $0xa0] sm:$0xff]  ;;  %v37_v49 = vld [vmem:[%s974_s1 + $0x18] sm:$0xff]  ;;  %v68_v52 = vld [vmem:[%s974_s1 + $0x110] sm:$0xff] }
  0x12   :  { %233 = vmatpush.msra.mxu3 %v90_v30  ;;  %214 = vmatpush.msra.mxu2 %v73_v32  ;;  %v85_v50 = vld [vmem:[%s974_s1 + $0x198] sm:$0xff]  ;;  %v36_v53 = vld [vmem:[%s974_s1 + $0x10] sm:$0xff]  ;;  %v67_v56 = vld [vmem:[%s974_s1 + $0x108] sm:$0xff] }
  0x13   :  { %193 = vmatpush.msra.mxu1 %v58_v31  ;;  %174 = vmatpush.msra.mxu0 %v41_v33  ;;  %v53_v51 = vld [vmem:[%s974_s1 + $0x98] sm:$0xff]  ;;  %v84_v54 = vld [vmem:[%s974_s1 + $0x190] sm:$0xff]  ;;  %v35_v57 = vld [vmem:[%s974_s1 + $0x8] sm:$0xff] }
  0x14   :  { %234 = vmatpush.msra.mxu3 %v89_v34  ;;  %215 = vmatpush.msra.mxu2 %v72_v36  ;;  %v52_v55 = vld [vmem:[%s974_s1 + $0x90] sm:$0xff]  ;;  %v83_v58 = vld [vmem:[%s974_s1 + $0x188] sm:$0xff]  ;;  %v66_v60 = vld [vmem:[%s974_s1 + $0x100] sm:$0xff] }
  0x15   :  { %194 = vmatpush.msra.mxu1 %v57_v35  ;;  %175 = vmatpush.msra.mxu0 %v40_v37  ;;  %v51_v59 = vld [vmem:[%s974_s1 + $0x88] sm:$0xff]  ;;  %v34_v61 = vld [vmem:[%s974_s1] sm:$0xff]  ;;  %v145_v62 = vld [vmem:[%s974_s1 + $0x378] sm:$0xff] }
  0x16   :  { %235 = vmatpush.msra.mxu3 %v88_v38  ;;  %216 = vmatpush.msra.mxu2 %v71_v40  ;;  %v82_v63 = vld [vmem:[%s974_s1 + $0x180] sm:$0xff]  ;;  %v113_v0 = vld [vmem:[%s974_s1 + $0x278] sm:$0xff]  ;;  %v144_v2 = vld [vmem:[%s974_s1 + $0x370] sm:$0xff] }
  0x17   :  { %195 = vmatpush.msra.mxu1 %v56_v39  ;;  %176 = vmatpush.msra.mxu0 %v39_v41  ;;  %v161_v1 = vld [vmem:[%s974_s1 + $0x3f8] sm:$0xff]  ;;  %v50_v3 = vld [vmem:[%s974_s1 + $0x80] sm:$0xff]  ;;  %v112_v4 = vld [vmem:[%s974_s1 + $0x270] sm:$0xff] }
  0x18   :  { %236 = vmatpush.msra.mxu3 %v87_v42  ;;  %217 = vmatpush.msra.mxu2 %v70_v44  ;;  %v129_v5 = vld [vmem:[%s974_s1 + $0x2f8] sm:$0xff]  ;;  %v143_v6 = vld [vmem:[%s974_s1 + $0x368] sm:$0xff]  ;;  %v160_v7 = vld [vmem:[%s974_s1 + $0x3f0] sm:$0xff] }
  0x19   :  { %196 = vmatpush.msra.mxu1 %v55_v43  ;;  %177 = vmatpush.msra.mxu0 %v38_v45  ;;  %v111_v8 = vld [vmem:[%s974_s1 + $0x268] sm:$0xff]  ;;  %v128_v9 = vld [vmem:[%s974_s1 + $0x2f0] sm:$0xff]  ;;  %v142_v10 = vld [vmem:[%s974_s1 + $0x360] sm:$0xff] }
  0x1a   :  { %237 = vmatpush.msra.mxu3 %v86_v46  ;;  %218 = vmatpush.msra.mxu2 %v69_v48  ;;  %v159_v11 = vld [vmem:[%s974_s1 + $0x3e8] sm:$0xff]  ;;  %v110_v12 = vld [vmem:[%s974_s1 + $0x260] sm:$0xff]  ;;  %v141_v14 = vld [vmem:[%s974_s1 + $0x358] sm:$0xff] }
  0x1b   :  { %197 = vmatpush.msra.mxu1 %v54_v47  ;;  %178 = vmatpush.msra.mxu0 %v37_v49  ;;  %v127_v13 = vld [vmem:[%s974_s1 + $0x2e8] sm:$0xff]  ;;  %v158_v15 = vld [vmem:[%s974_s1 + $0x3e0] sm:$0xff]  ;;  %v109_v16 = vld [vmem:[%s974_s1 + $0x258] sm:$0xff] }
  0x1c   :  { %238 = vmatpush.msra.mxu3 %v85_v50  ;;  %219 = vmatpush.msra.mxu2 %v68_v52  ;;  %v126_v17 = vld [vmem:[%s974_s1 + $0x2e0] sm:$0xff]  ;;  %v140_v18 = vld [vmem:[%s974_s1 + $0x350] sm:$0xff]  ;;  %v157_v19 = vld [vmem:[%s974_s1 + $0x3d8] sm:$0xff] }
  0x1d   :  { %198 = vmatpush.msra.mxu1 %v53_v51  ;;  %179 = vmatpush.msra.mxu0 %v36_v53  ;;  %v108_v20 = vld [vmem:[%s974_s1 + $0x250] sm:$0xff]  ;;  %v125_v21 = vld [vmem:[%s974_s1 + $0x2d8] sm:$0xff]  ;;  %v139_v22 = vld [vmem:[%s974_s1 + $0x348] sm:$0xff] }
  0x1e   :  { %239 = vmatpush.msra.mxu3 %v84_v54  ;;  %220 = vmatpush.msra.mxu2 %v67_v56  ;;  %v156_v23 = vld [vmem:[%s974_s1 + $0x3d0] sm:$0xff]  ;;  %v107_v24 = vld [vmem:[%s974_s1 + $0x248] sm:$0xff]  ;;  %v138_v26 = vld [vmem:[%s974_s1 + $0x340] sm:$0xff] }
  0x1f   :  { %199 = vmatpush.msra.mxu1 %v52_v55  ;;  %180 = vmatpush.msra.mxu0 %v35_v57  ;;  %v124_v25 = vld [vmem:[%s974_s1 + $0x2d0] sm:$0xff]  ;;  %v155_v27 = vld [vmem:[%s974_s1 + $0x3c8] sm:$0xff]  ;;  %v106_v28 = vld [vmem:[%s974_s1 + $0x240] sm:$0xff] }
  0x20   :  { %240 = vmatpush.msra.mxu3 %v83_v58  ;;  %221 = vmatpush.msra.mxu2 %v66_v60  ;;  %v123_v29 = vld [vmem:[%s974_s1 + $0x2c8] sm:$0xff]  ;;  %v137_v30 = vld [vmem:[%s974_s1 + $0x338] sm:$0xff]  ;;  %v154_v31 = vld [vmem:[%s974_s1 + $0x3c0] sm:$0xff] }
  0x21   :  { %200 = vmatpush.msra.mxu1 %v51_v59  ;;  %181 = vmatpush.msra.mxu0 %v34_v61  ;;  %v105_v32 = vld [vmem:[%s974_s1 + $0x238] sm:$0xff]  ;;  %v122_v33 = vld [vmem:[%s974_s1 + $0x2c0] sm:$0xff]  ;;  %v136_v34 = vld [vmem:[%s974_s1 + $0x330] sm:$0xff] }
  0x22   :  { %286 = vmatpush.msrb.mxu2 %v145_v62  ;;  %241 = vmatpush.msra.mxu3 %v82_v63  ;;  %v153_v35 = vld [vmem:[%s974_s1 + $0x3b8] sm:$0xff]  ;;  %v104_v36 = vld [vmem:[%s974_s1 + $0x230] sm:$0xff]  ;;  %v135_v38 = vld [vmem:[%s974_s1 + $0x328] sm:$0xff] }
  0x23   :  { %246 = vmatpush.msrb.mxu0 %v113_v0  ;;  %201 = vmatpush.msra.mxu1 %v50_v3  ;;  %v121_v37 = vld [vmem:[%s974_s1 + $0x2b8] sm:$0xff]  ;;  %v152_v39 = vld [vmem:[%s974_s1 + $0x3b0] sm:$0xff]  ;;  %v103_v40 = vld [vmem:[%s974_s1 + $0x228] sm:$0xff] }
  0x24   :  { %306 = vmatpush.msrb.mxu3 %v161_v1  ;;  %287 = vmatpush.msrb.mxu2 %v144_v2  ;;  %v120_v41 = vld [vmem:[%s974_s1 + $0x2b0] sm:$0xff]  ;;  %v134_v42 = vld [vmem:[%s974_s1 + $0x320] sm:$0xff]  ;;  %v151_v43 = vld [vmem:[%s974_s1 + $0x3a8] sm:$0xff] }
  0x25   :  { %247 = vmatpush.msrb.mxu0 %v112_v4  ;;  %266 = vmatpush.msrb.mxu1 %v129_v5  ;;  %v28_v44 = vld [vmem:[%s976_s0 + $0x10] sm:$0xff]  ;;  %v102_v45 = vld [vmem:[%s974_s1 + $0x220] sm:$0xff]  ;;  %v119_v46 = vld [vmem:[%s974_s1 + $0x2a8] sm:$0xff] }
  0x26   :  { %288 = vmatpush.msrb.mxu2 %v143_v6  ;;  %307 = vmatpush.msrb.mxu3 %v160_v7  ;;  %v133_v47 = vld [vmem:[%s974_s1 + $0x318] sm:$0xff]  ;;  %v150_v48 = vld [vmem:[%s974_s1 + $0x3a0] sm:$0xff]  ;;  %v132_v53 = vld [vmem:[%s974_s1 + $0x310] sm:$0xff] }
  0x27   :  { %248 = vmatpush.msrb.mxu0 %v111_v8  ;;  %267 = vmatpush.msrb.mxu1 %v128_v9  ;;  %v26_v49 = vld [vmem:[%s976_s0] sm:$0xff]  ;;  %v29_v50 = vld [vmem:[%s976_s0 + $0x18] sm:$0xff]  ;;  %v27_v55 = vld [vmem:[%s976_s0 + $0x8] sm:$0xff] }
  0x28   :  { %289 = vmatpush.msrb.mxu2 %v142_v10  ;;  %308 = vmatpush.msrb.mxu3 %v159_v11  ;;  %v101_v51 = vld [vmem:[%s974_s1 + $0x218] sm:$0xff]  ;;  %v118_v52 = vld [vmem:[%s974_s1 + $0x2a0] sm:$0xff]  ;;  %v100_v56 = vld [vmem:[%s974_s1 + $0x210] sm:$0xff] }
  0x29   :  { %249 = vmatpush.msrb.mxu0 %v110_v12  ;;  %268 = vmatpush.msrb.mxu1 %v127_v13  ;;  %v149_v54 = vld [vmem:[%s974_s1 + $0x398] sm:$0xff]  ;;  %v131_v58 = vld [vmem:[%s974_s1 + $0x308] sm:$0xff]  ;;  %v148_v59 = vld [vmem:[%s974_s1 + $0x390] sm:$0xff] }
  0x2a   :  { %290 = vmatpush.msrb.mxu2 %v141_v14  ;;  %309 = vmatpush.msrb.mxu3 %v158_v15  ;;  %v117_v57 = vld [vmem:[%s974_s1 + $0x298] sm:$0xff]  ;;  %v99_v60 = vld [vmem:[%s974_s1 + $0x208] sm:$0xff]  ;;  %v116_v61 = vld [vmem:[%s974_s1 + $0x290] sm:$0xff] }
  0x2b   :  { %250 = vmatpush.msrb.mxu0 %v109_v16  ;;  %269 = vmatpush.msrb.mxu1 %v126_v17  ;;  %v130_v62 = vld [vmem:[%s974_s1 + $0x300] sm:$0xff]  ;;  %v147_v63 = vld [vmem:[%s974_s1 + $0x388] sm:$0xff]  ;;  %v32_v0 = vld [vmem:[%s976_s0 + $0x30] sm:$0xff] }
  0x2c   :  { %291 = vmatpush.msrb.mxu2 %v140_v18  ;;  %310 = vmatpush.msrb.mxu3 %v157_v19  ;;  %v98_v1 = vld [vmem:[%s974_s1 + $0x200] sm:$0xff]  ;;  %v115_v2 = vld [vmem:[%s974_s1 + $0x288] sm:$0xff]  ;;  %v33_v5 = vld [vmem:[%s976_s0 + $0x38] sm:$0xff] }
  0x2d   :  { %251 = vmatpush.msrb.mxu0 %v108_v20  ;;  %270 = vmatpush.msrb.mxu1 %v125_v21  ;;  %v146_v3 = vld [vmem:[%s974_s1 + $0x380] sm:$0xff]  ;;  %v343_v7 = vld [vmem:[%s977_s3 + $0x78] sm:$0xff]  ;;  %v31_v8 = vld [vmem:[%s976_s0 + $0x28] sm:$0xff] }
  0x2e   :  { %292 = vmatpush.msrb.mxu2 %v139_v22  ;;  %311 = vmatpush.msrb.mxu3 %v156_v23  ;;  %v30_v4 = vld [vmem:[%s976_s0 + $0x20] sm:$0xff]  ;;  %v342_v9 = vld [vmem:[%s977_s3 + $0x70] sm:$0xff]  ;;  %v341_v10 = vld [vmem:[%s977_s3 + $0x68] sm:$0xff] }
  0x2f   :  { %252 = vmatpush.msrb.mxu0 %v107_v24  ;;  %271 = vmatpush.msrb.mxu1 %v124_v25  ;;  %v114_v6 = vld [vmem:[%s974_s1 + $0x280] sm:$0xff]  ;;  %v339_v12 = vld [vmem:[%s977_s3 + $0x58] sm:$0xff]  ;;  %v338_v13 = vld [vmem:[%s977_s3 + $0x50] sm:$0xff] }
  0x30   :  { %293 = vmatpush.msrb.mxu2 %v138_v26  ;;  %312 = vmatpush.msrb.mxu3 %v155_v27  ;;  %v340_v11 = vld [vmem:[%s977_s3 + $0x60] sm:$0xff]  ;;  %v337_v14 = vld [vmem:[%s977_s3 + $0x48] sm:$0xff]  ;;  %v335_v16 = vld [vmem:[%s977_s3 + $0x38] sm:$0xff] }
  0x31   :  { %253 = vmatpush.msrb.mxu0 %v106_v28  ;;  %272 = vmatpush.msrb.mxu1 %v123_v29  ;;  %v336_v15 = vld [vmem:[%s977_s3 + $0x40] sm:$0xff]  ;;  %v334_v17 = vld [vmem:[%s977_s3 + $0x30] sm:$0xff]  ;;  %v333_v18 = vld [vmem:[%s977_s3 + $0x28] sm:$0xff] }
  0x32   :  { %294 = vmatpush.msrb.mxu2 %v137_v30  ;;  %313 = vmatpush.msrb.mxu3 %v154_v31  ;;  %v332_v19 = vld [vmem:[%s977_s3 + $0x20] sm:$0xff]  ;;  %v331_v20 = vld [vmem:[%s977_s3 + $0x18] sm:$0xff]  ;;  %v330_v21 = vld [vmem:[%s977_s3 + $0x10] sm:$0xff] }
  0x33   :  { %254 = vmatpush.msrb.mxu0 %v105_v32  ;;  %273 = vmatpush.msrb.mxu1 %v122_v33  ;;  %v329_v22 = vld [vmem:[%s977_s3 + $0x8] sm:$0xff]  ;;  %v328_v23 = vld [vmem:[%s977_s3] sm:$0xff]  ;;  %v385_v24 = vld [vmem:[%s979_s5 + $0x78] sm:$0xff] }
  0x34   :  { %295 = vmatpush.msrb.mxu2 %v136_v34  ;;  %314 = vmatpush.msrb.mxu3 %v153_v35  ;;  %v384_v25 = vld [vmem:[%s979_s5 + $0x70] sm:$0xff]  ;;  %v383_v26 = vld [vmem:[%s979_s5 + $0x68] sm:$0xff]  ;;  %v382_v27 = vld [vmem:[%s979_s5 + $0x60] sm:$0xff] }
  0x35   :  { %255 = vmatpush.msrb.mxu0 %v104_v36  ;;  %274 = vmatpush.msrb.mxu1 %v121_v37  ;;  %v415_v28 = vld [vmem:[%s975_s2] ss:$0 sm:$0xff]  ;;  %v381_v29 = vld [vmem:[%s979_s5 + $0x58] sm:$0xff]  ;;  %v380_v30 = vld [vmem:[%s979_s5 + $0x50] sm:$0xff] }
  0x36   :  { %296 = vmatpush.msrb.mxu2 %v135_v38  ;;  %315 = vmatpush.msrb.mxu3 %v152_v39  ;;  %v379_v33 = vld [vmem:[%s979_s5 + $0x48] sm:$0xff]  ;;  %v378_v35 = vld [vmem:[%s979_s5 + $0x40] sm:$0xff]  ;;  %v377_v38 = vld [vmem:[%s979_s5 + $0x38] sm:$0xff] }
  0x37   :  { %256 = vmatpush.msrb.mxu0 %v103_v40  ;;  %275 = vmatpush.msrb.mxu1 %v120_v41  ;;  %v376_v41 = vld [vmem:[%s979_s5 + $0x30] sm:$0xff] }
  0x38   :  { %297 = vmatpush.msrb.mxu2 %v134_v42  ;;  %316 = vmatpush.msrb.mxu3 %v151_v43  ;;  %v375_v43 = vld [vmem:[%s979_s5 + $0x28] sm:$0xff] }
  0x39   :  { %222 = vmatmul.f32.vlgmr.msra.gmra.mxu2 %v28_v44  ;;  %257 = vmatpush.msrb.mxu0 %v102_v45 }
  0x3a   :  { %276 = vmatpush.msrb.mxu1 %v119_v46  ;;  %298 = vmatpush.msrb.mxu2 %v133_v47  ;;  %v374_v46 = vld [vmem:[%s979_s5 + $0x20] sm:$0xff] }
  0x3b   :  { %317 = vmatpush.msrb.mxu3 %v150_v48  ;;  %182 = vmatmul.f32.vlgmr.msra.gmra.mxu0 %v26_v49 }
  0x3c   :  { %242 = vmatmul.f32.vlgmr.msra.gmra.mxu3 %v29_v50  ;;  %258 = vmatpush.msrb.mxu0 %v101_v51 }
  0x3d   :  { %277 = vmatpush.msrb.mxu1 %v118_v52  ;;  %299 = vmatpush.msrb.mxu2 %v132_v53 }
  0x3e   :  { %318 = vmatpush.msrb.mxu3 %v149_v54  ;;  %202 = vmatmul.f32.vlgmr.msra.gmra.mxu1 %v27_v55  ;;  %v373_v55 = vld [vmem:[%s979_s5 + $0x18] sm:$0xff] }
  0x3f   :  { %259 = vmatpush.msrb.mxu0 %v100_v56  ;;  %278 = vmatpush.msrb.mxu1 %v117_v57  ;;  %v372_v56 = vld [vmem:[%s979_s5 + $0x10] sm:$0xff]  ;;  %v371_v57 = vld [vmem:[%s979_s5 + $0x8] sm:$0xff] }
  0x40   :  { %300 = vmatpush.msrb.mxu2 %v131_v58  ;;  %319 = vmatpush.msrb.mxu3 %v148_v59  ;;  %v370_v58 = vld [vmem:[%s979_s5] sm:$0xff] }
  0x41   :  { %260 = vmatpush.msrb.mxu0 %v99_v60  ;;  %279 = vmatpush.msrb.mxu1 %v116_v61  ;;  %v416_v59 = vld [vmem:[%s978_s4] ss:$0 sm:$0xff] }
  0x42   :  { %301 = vmatpush.msrb.mxu2 %v130_v62  ;;  %320 = vmatpush.msrb.mxu3 %v147_v63 }
  0x43   :  { %302 = vmatmul.f32.vlgmr.msrb.gmra.mxu2 %v32_v0  ;;  %261 = vmatpush.msrb.mxu0 %v98_v1  ;;  %v417_v0 = vld [vmem:[%s980_s6] ss:$0 sm:$0xff] }
  0x44   :  { %280 = vmatpush.msrb.mxu1 %v115_v2  ;;  %321 = vmatpush.msrb.mxu3 %v146_v3 }
  0x45   :  { %262 = vmatmul.f32.vlgmr.msrb.gmra.mxu0 %v30_v4  ;;  %322 = vmatmul.f32.vlgmr.msrb.gmra.mxu3 %v33_v5 }
  0x46   :  { %281 = vmatpush.msrb.mxu1 %v114_v6  ;;  %348 = vmatpush.msra.mxu0 %v343_v7 }
  0x47   :  { %282 = vmatmul.f32.vlgmr.msrb.gmra.mxu1 %v31_v8 }
  0x48   :  { %349 = vmatpush.msra.mxu0 %v342_v9  ;;  %390 = vmatpush.msra.mxu1 %v385_v24 }
  0x4a   :  { %350 = vmatpush.msra.mxu0 %v341_v10  ;;  %391 = vmatpush.msra.mxu1 %v384_v25 }
  0x4c   :  { %351 = vmatpush.msra.mxu0 %v340_v11  ;;  %392 = vmatpush.msra.mxu1 %v383_v26 }
  0x4e   :  { %352 = vmatpush.msra.mxu0 %v339_v12  ;;  %393 = vmatpush.msra.mxu1 %v382_v27 }
  0x50   :  { %353 = vmatpush.msra.mxu0 %v338_v13  ;;  %394 = vmatpush.msra.mxu1 %v381_v29 }
  0x52   :  { %354 = vmatpush.msra.mxu0 %v337_v14  ;;  %395 = vmatpush.msra.mxu1 %v380_v30 }
  0x54   :  { %355 = vmatpush.msra.mxu0 %v336_v15  ;;  %396 = vmatpush.msra.mxu1 %v379_v33 }
  0x56   :  { %356 = vmatpush.msra.mxu0 %v335_v16  ;;  %397 = vmatpush.msra.mxu1 %v378_v35 }
  0x58   :  { %357 = vmatpush.msra.mxu0 %v334_v17  ;;  %398 = vmatpush.msra.mxu1 %v377_v38 }
  0x5a   :  { %358 = vmatpush.msra.mxu0 %v333_v18  ;;  %399 = vmatpush.msra.mxu1 %v376_v41 }
  0x5c   :  { %359 = vmatpush.msra.mxu0 %v332_v19  ;;  %400 = vmatpush.msra.mxu1 %v375_v43 }
  0x5e   :  { %360 = vmatpush.msra.mxu0 %v331_v20  ;;  %401 = vmatpush.msra.mxu1 %v374_v46 }
  0x60   :  { %361 = vmatpush.msra.mxu0 %v330_v21  ;;  %402 = vmatpush.msra.mxu1 %v373_v55 }
  0x62   :  { %362 = vmatpush.msra.mxu0 %v329_v22  ;;  %403 = vmatpush.msra.mxu1 %v372_v56 }
  0x64   :  { %363 = vmatpush.msra.mxu0 %v328_v23  ;;  %404 = vmatpush.msra.mxu1 %v371_v57 }
  0x66   :  { %405 = vmatpush.msra.mxu1 %v370_v58 }
  0xb8   :  { %v183_v31 = vpop.f32.mrf.mxu0 }
  0xb9   :  { %v184_v32 = vadd.f32 %v415_v28, %v183_v31 }
  0xbb   :  { %v203_v34 = vpop.f32.mrf.mxu1 }
  0xbc   :  { %v204_v36 = vadd.f32 %v203_v34, %v184_v32  ;;  %v223_v37 = vpop.f32.mrf.mxu2 }
  0xbe   :  { %v224_v39 = vadd.f32 %v223_v37, %v204_v36 }
  0xbf   :  { %v243_v40 = vpop.f32.mrf.mxu3 }
  0xc0   :  { %v244_v42 = vadd.f32 %v243_v40, %v224_v39 }
  0xc2   :  { %v263_v44 = vpop.f32.mrf.mxu0 }
  0xc3   :  { %v264_v45 = vadd.f32 %v263_v44, %v244_v42 }
  0xc4   :  { %v283_v47 = vpop.f32.mrf.mxu1 }
  0xc5   :  { %v284_v48 = vadd.f32 %v283_v47, %v264_v45 }
  0xc6   :  { %v303_v49 = vpop.f32.mrf.mxu2 }
  0xc7   :  { %v304_v50 = vadd.f32 %v303_v49, %v284_v48 }
  0xc8   :  { %v323_v51 = vpop.f32.mrf.mxu3 }
  0xc9   :  { %v324_v52 = vadd.f32 %v323_v51, %v304_v50 }
  0xcb   :  { %v326_v53 = vmul.f32 0.02, %v324_v52 }
  0xcd   :  { %v327_v54 = vmax.f32 %v324_v52, %v326_v53 }
  0xcf   :  { %364 = vmatmul.f32.vlgmr.msra.gmra.mxu0 %v327_v54 }
 0x14c   :  { %v365_v60 = vpop.f32.mrf.mxu0 }
 0x14d   :  { %v366_v61 = vadd.f32 %v416_v59, %v365_v60 }
 0x14f   :  { %v368_v62 = vmul.f32 0.02, %v366_v61 }
 0x151   :  { %v369_v63 = vmax.f32 %v366_v61, %v368_v62 }
 0x153   :  { %406 = vmatmul.f32.vlgmr.msra.gmra.mxu1 %v369_v63 }
 0x1d0   :  { %v407_v1 = vpop.f32.mrf.mxu1 }
 0x1d1   :  { %v408_v2 = vadd.f32 %v417_v0, %v407_v1 }
 0x1d3   :  { %410 = vst [vmem:[%s981_s7] sm:$0xff] %v408_v2 }

</bundles_post_ra>
